<compile_context>
chip_gen: v5e
topology: v5e:2x2
jax: 0.10.0
libtpu: 0.0.40
codegen_flags: <defaults>
</compile_context>

<pallas_src>
import functools
from math import pi

import jax
import jax.numpy as jnp
from jax.experimental import pallas as pl
from jax.experimental.pallas import tpu as pltpu


def _read_noise_kernel(params_ref, yy_ref, xx_ref, x_ref, noise_ref, o_ref, *,
                       sigma_min, sigma_max):
    # params_ref: (bt, 8) f32 in VMEM; columns: x0, y0, a, b, c, bmax, baseline, pad
    p = params_ref[...]
    x0 = p[:, 0:1]
    y0 = p[:, 1:2]
    a = p[:, 2:3]
    b = p[:, 3:4]
    c = p[:, 4:5]
    bmax = p[:, 5:6]
    baseline = p[:, 6:7]

    yy = yy_ref[...]          # (1, P) centered row coords, resident in VMEM
    xx = xx_ref[...]          # (1, P) centered col coords, resident in VMEM

    # Rotated-Gaussian-like non-uniform background, vectorized over sub-batch.
    dx = xx - x0              # (bt, P)
    dy = yy - y0
    q = a * dx * dx + 2.0 * b * dx * dy + c * dy * dy
    h = jnp.exp(-(q * q))

    maxh = jnp.max(h, axis=-1, keepdims=True)          # (bt, 1)
    ht = jnp.where(h < 1e-6 * maxh, 0.0, h)
    minh = jnp.min(ht, axis=-1, keepdims=True)         # (bt, 1)
    # One scale per sample instead of a per-pixel divide.  Tiny guard keeps
    # padded/degenerate samples NaN-free (reference has the same 0/0 hazard).
    scale = bmax / jnp.maximum(maxh - minh, 1e-30)
    bg01 = (ht - minh) * scale                          # in [0, bmax]

    # bg_01 -> per-pixel read-noise std, then compose the read noise.
    bg_std = bg01 * (sigma_max - sigma_min) + sigma_min
    read_noise = baseline + bg_std * noise_ref[...]     # (bt, P)

    # Broadcast the read-noise map over channels and clamp at 0.
    o_ref[...] = jnp.maximum(x_ref[...] + read_noise[:, None, :], 0.0)


def read_noise_forward(x, params, noise, *, sigma_read_range, b_tile=16):
    """x: (N, C, H, W) f32, params: (N, 8) f32, noise: (N, 1, H, W) f32."""
    N, C, H, W = x.shape
    P = H * W

    bt = min(b_tile, N)
    n_pad = (-N) % bt
    if n_pad:  # pad batch to a multiple of the batch tile; padded rows are sliced off
        x = jnp.pad(x, ((0, n_pad), (0, 0), (0, 0), (0, 0)))
        noise = jnp.pad(noise, ((0, n_pad), (0, 0), (0, 0), (0, 0)))
        params = jnp.pad(params, ((0, n_pad), (0, 0)))
    Np = N + n_pad

    # Lane-dense slabs: last dim = H*W (256 for 16x16 -> multiple of 128).
    x_flat = x.reshape(Np, C, P).astype(jnp.float32)
    noise_flat = noise.reshape(Np, P).astype(jnp.float32)

    # Precomputed centered meshgrid (same as np.ogrid[-m:m+1, -n:n+1]),
    # flattened to match the lane-dense layout.
    yv = jnp.arange(H, dtype=jnp.float32) - (H - 1.0) / 2.0
    xv = jnp.arange(W, dtype=jnp.float32) - (W - 1.0) / 2.0
    yy = jnp.broadcast_to(yv[:, None], (H, W)).reshape(1, P)
    xx = jnp.broadcast_to(xv[None, :], (H, W)).reshape(1, P)

    kernel = functools.partial(
        _read_noise_kernel,
        sigma_min=float(sigma_read_range[0]),
        sigma_max=float(sigma_read_range[1]))

    out_flat = pl.pallas_call(
        kernel,
        out_shape=jax.ShapeDtypeStruct((Np, C, P), jnp.float32),
        grid_spec=pltpu.PrefetchScalarGridSpec(
            num_scalar_prefetch=0,
            grid=(Np // bt,),
            in_specs=[
                pl.BlockSpec((bt, 8), lambda i: (i, 0)),         # per-sample scalars
                pl.BlockSpec((1, P), lambda i: (0, 0)),          # yy (resident)
                pl.BlockSpec((1, P), lambda i: (0, 0)),          # xx (resident)
                pl.BlockSpec((bt, C, P), lambda i: (i, 0, 0)),   # input image
                pl.BlockSpec((bt, P), lambda i: (i, 0)),         # standard-normal noise
            ],
            out_specs=pl.BlockSpec((bt, C, P), lambda i: (i, 0, 0)),
        ),
        compiler_params=pltpu.CompilerParams(
            # Keep batch tiles "parallel" -> megacore sharding on v7x,
            # harmless no-op on v5e/v6e.
            dimension_semantics=("parallel",)),
    )(params.astype(jnp.float32), yy, xx, x_flat, noise_flat)

    return out_flat.reshape(Np, C, H, W)[:N]


def make_read_noise_params(key, setup_params, nbatch):
    """Glue: deterministic draws replacing torch.rand(1) calls in forward()."""
    H, W = setup_params['H'], setup_params['W']
    off_x, off_y = setup_params['nonunif_bg_offset']
    amin, amax = setup_params['nonunif_bg_theta_range']
    bl_min, bl_max = setup_params['read_noise_baseline_range']
    # Inside ReadNoise.__init__ the NonUniformBg is built with minvals [0, 1]:
    bmax0 = 1.0   # bmin0 == 0 -> bmin_i == 0 exactly

    keys = jax.random.split(key, 7)
    u = lambda k, shape: jax.random.uniform(k, shape, jnp.float32)

    x0 = -off_x + u(keys[0], (nbatch,)) * off_x * 2.0
    y0 = -off_y + u(keys[1], (nbatch,)) * off_y * 2.0
    sigmax = W / 5.0 + u(keys[2], (nbatch,)) * W / 5.0
    sigmay = H / 5.0 + u(keys[3], (nbatch,)) * H / 5.0
    theta = amin + u(keys[4], (nbatch,)) * (amax - amin)

    a = jnp.cos(theta) ** 2 / (2 * sigmax ** 2) + jnp.sin(theta) ** 2 / (2 * sigmay ** 2)
    b = (-jnp.sin(2 * theta) / (4 * sigmax ** 2)
         + jnp.sin(2 * theta) / (4 * sigmay ** 2))
    c = jnp.sin(theta) ** 2 / (2 * sigmax ** 2) + jnp.cos(theta) ** 2 / (2 * sigmay ** 2)
    bmax = bmax0 + u(keys[5], (nbatch,)) * bmax0 / 2.0

    baseline = u(keys[6], (1,)) * (bl_max - bl_min) + bl_min
    baseline = jnp.broadcast_to(baseline, (nbatch,))

    pad = jnp.zeros((nbatch,), jnp.float32)
    return jnp.stack([x0, y0, a, b, c, bmax, baseline, pad],
                     axis=1).astype(jnp.float32)


def _reference(x, params, noise, sigma_range):
    """Pure-JAX reference of ReadNoise.forward (std_nonunif=True)."""
    sigma_min, sigma_max = sigma_range
    N, C, H, W = x.shape
    yy = (jnp.arange(H, dtype=jnp.float32) - (H - 1) / 2.0)[:, None]
    xx = (jnp.arange(W, dtype=jnp.float32) - (W - 1) / 2.0)[None, :]
    outs = []
    for i in range(N):
        x0, y0, a, b, c, bmax, baseline = [params[i, j] for j in range(7)]
        dx = xx - x0
        dy = yy - y0
        q = a * dx * dx + 2 * b * dx * dy + c * dy * dy
        h = jnp.exp(-(q * q))
        maxh = h.max()
        h = jnp.where(h < 1e-6 * maxh, 0.0, h)
        minh = h.min()
        bg01 = (h - minh) / (maxh - minh) * bmax
        bg_std = bg01 * (sigma_max - sigma_min) + sigma_min
        rn = baseline + bg_std * noise[i, 0]
        outs.append(jnp.maximum(x[i] + rn[None], 0.0))
    return jnp.stack(outs)


if __name__ == "__main__":
    setup_params = dict(
        read_noise_nonuinf=True,
        batch_size_gen=2,
        H=16, W=16,
        nonunif_bg_offset=[2.0, 2.0],
        nonunif_bg_theta_range=[-pi / 4.0, pi / 4.0],
        nonunif_bg_minvals=[3.0, 20.0],
        read_noise_std_range=[1.0, 5.0],
        read_noise_baseline_range=[10.0, 20.0],
        device='tpu',
    )
    N, C, H, W = 2, 4, 16, 16

    key = jax.random.PRNGKey(0)
    k_in, k_par, k_noise = jax.random.split(key, 3)

    x = jax.random.uniform(k_in, (N, C, H, W), jnp.float32) * 50.0
    params = make_read_noise_params(k_par, setup_params, N)
    noise = jax.random.normal(k_noise, (N, 1, H, W), jnp.float32)

    out = read_noise_forward(
        x, params, noise,
        sigma_read_range=setup_params['read_noise_std_range'])
    out = jax.block_until_ready(out)

    ref = _reference(x, params, noise, setup_params['read_noise_std_range'])
    assert out.shape == (N, C, H, W) and out.dtype == jnp.float32
    assert jnp.allclose(out, ref, atol=1e-4, rtol=1e-5), "mismatch vs reference"

    print("KERNEL_OK")
</pallas_src>

<mosaic_0001>
module attributes {stable_mosaic.version = 11 : i64} {
  func.func @_read_noise_kernel(%arg0: i32, %arg1: memref<2x8xf32, #tpu.memory_space<vmem>>, %arg2: memref<1x256xf32, #tpu.memory_space<vmem>>, %arg3: memref<1x256xf32, #tpu.memory_space<vmem>>, %arg4: memref<2x4x256xf32, #tpu.memory_space<vmem>>, %arg5: memref<2x256xf32, #tpu.memory_space<vmem>>, %arg6: memref<2x4x256xf32, #tpu.memory_space<vmem>>) attributes {dimension_semantics = [#tpu.dimension_semantics<parallel>], iteration_bounds = array<i64: 1>, scalar_prefetch = 0 : i64, scratch_operands = 0 : i64, tpu.core_type = #tpu.core_type<tc>, window_params = [{transform_indices = @transform_0, window_bounds = array<i64: 2, 8>}, {pipeline_mode = #tpu.pipeline_mode<synchronous>, transform_indices = @transform_1, window_bounds = array<i64: 1, 256>}, {pipeline_mode = #tpu.pipeline_mode<synchronous>, transform_indices = @transform_2, window_bounds = array<i64: 1, 256>}, {transform_indices = @transform_3, window_bounds = array<i64: 2, 4, 256>}, {transform_indices = @transform_4, window_bounds = array<i64: 2, 256>}, {transform_indices = @transform_5, window_bounds = array<i64: 2, 4, 256>}]} {
    %c0 = arith.constant 0 : index
    %c0_0 = arith.constant 0 : index
    %0 = vector.load %arg1[%c0, %c0_0] : memref<2x8xf32, #tpu.memory_space<vmem>>, vector<2x8xf32>
    %1 = vector.extract_strided_slice %0 {offsets = [0, 0], sizes = [2, 1], strides = [1, 1]} : vector<2x8xf32> to vector<2x1xf32>
    %2 = vector.extract_strided_slice %0 {offsets = [0, 1], sizes = [2, 1], strides = [1, 1]} : vector<2x8xf32> to vector<2x1xf32>
    %3 = vector.extract_strided_slice %0 {offsets = [0, 2], sizes = [2, 1], strides = [1, 1]} : vector<2x8xf32> to vector<2x1xf32>
    %4 = vector.extract_strided_slice %0 {offsets = [0, 3], sizes = [2, 1], strides = [1, 1]} : vector<2x8xf32> to vector<2x1xf32>
    %5 = vector.extract_strided_slice %0 {offsets = [0, 4], sizes = [2, 1], strides = [1, 1]} : vector<2x8xf32> to vector<2x1xf32>
    %6 = vector.extract_strided_slice %0 {offsets = [0, 5], sizes = [2, 1], strides = [1, 1]} : vector<2x8xf32> to vector<2x1xf32>
    %7 = vector.extract_strided_slice %0 {offsets = [0, 6], sizes = [2, 1], strides = [1, 1]} : vector<2x8xf32> to vector<2x1xf32>
    %c0_1 = arith.constant 0 : index
    %c0_2 = arith.constant 0 : index
    %8 = vector.load %arg2[%c0_1, %c0_2] : memref<1x256xf32, #tpu.memory_space<vmem>>, vector<1x256xf32>
    %c0_3 = arith.constant 0 : index
    %c0_4 = arith.constant 0 : index
    %9 = vector.load %arg3[%c0_3, %c0_4] : memref<1x256xf32, #tpu.memory_space<vmem>>, vector<1x256xf32>
    %10 = vector.broadcast %9 : vector<1x256xf32> to vector<2x256xf32>
    %11 = vector.broadcast %1 : vector<2x1xf32> to vector<2x256xf32>
    %12 = arith.subf %10, %11 : vector<2x256xf32>
    %13 = vector.broadcast %8 : vector<1x256xf32> to vector<2x256xf32>
    %14 = vector.broadcast %2 : vector<2x1xf32> to vector<2x256xf32>
    %15 = arith.subf %13, %14 : vector<2x256xf32>
    %16 = vector.broadcast %3 : vector<2x1xf32> to vector<2x256xf32>
    %17 = arith.mulf %16, %12 : vector<2x256xf32>
    %18 = arith.mulf %17, %12 : vector<2x256xf32>
    %cst = arith.constant 2.000000e+00 : f32
    %19 = vector.broadcast %cst : f32 to vector<2x1xf32>
    %20 = arith.mulf %19, %4 : vector<2x1xf32>
    %21 = vector.broadcast %20 : vector<2x1xf32> to vector<2x256xf32>
    %22 = arith.mulf %21, %12 : vector<2x256xf32>
    %23 = arith.mulf %22, %15 : vector<2x256xf32>
    %24 = arith.addf %18, %23 : vector<2x256xf32>
    %25 = vector.broadcast %5 : vector<2x1xf32> to vector<2x256xf32>
    %26 = arith.mulf %25, %15 : vector<2x256xf32>
    %27 = arith.mulf %26, %15 : vector<2x256xf32>
    %28 = arith.addf %24, %27 : vector<2x256xf32>
    %29 = arith.mulf %28, %28 : vector<2x256xf32>
    %cst_5 = arith.constant 0.000000e+00 : f32
    %30 = vector.broadcast %cst_5 : f32 to vector<2x256xf32>
    %31 = arith.subf %30, %29 : vector<2x256xf32>
    %32 = math.exp %31 : vector<2x256xf32>
    %cst_6 = arith.constant dense<0xFF800000> : vector<2xf32>
    %33 = vector.multi_reduction <maximumf>, %32, %cst_6 [1] : vector<2x256xf32> to vector<2xf32>
    %34 = vector.shape_cast %33 : vector<2xf32> to vector<2x1xf32>
    %cst_7 = arith.constant 9.99999997E-7 : f32
    %35 = vector.broadcast %cst_7 : f32 to vector<2x1xf32>
    %36 = arith.mulf %35, %34 : vector<2x1xf32>
    %37 = vector.broadcast %36 : vector<2x1xf32> to vector<2x256xf32>
    %38 = arith.cmpf olt, %32, %37 : vector<2x256xf32>
    %cst_8 = arith.constant 0.000000e+00 : f32
    %39 = vector.broadcast %cst_8 : f32 to vector<2x256xf32>
    %40 = arith.select %38, %39, %32 : vector<2x256xi1>, vector<2x256xf32>
    %cst_9 = arith.constant dense<0x7F800000> : vector<2xf32>
    %41 = vector.multi_reduction <minimumf>, %40, %cst_9 [1] : vector<2x256xf32> to vector<2xf32>
    %42 = vector.shape_cast %41 : vector<2xf32> to vector<2x1xf32>
    %43 = arith.subf %34, %42 : vector<2x1xf32>
    %cst_10 = arith.constant 1.000000e-30 : f32
    %44 = vector.broadcast %cst_10 : f32 to vector<2x1xf32>
    %45 = arith.maximumf %43, %44 : vector<2x1xf32>
    %46 = arith.divf %6, %45 : vector<2x1xf32>
    %47 = vector.broadcast %42 : vector<2x1xf32> to vector<2x256xf32>
    %48 = arith.subf %40, %47 : vector<2x256xf32>
    %49 = vector.broadcast %46 : vector<2x1xf32> to vector<2x256xf32>
    %50 = arith.mulf %48, %49 : vector<2x256xf32>
    %cst_11 = arith.constant 4.000000e+00 : f32
    %51 = vector.broadcast %cst_11 : f32 to vector<2x256xf32>
    %52 = arith.mulf %50, %51 : vector<2x256xf32>
    %cst_12 = arith.constant 1.000000e+00 : f32
    %53 = vector.broadcast %cst_12 : f32 to vector<2x256xf32>
    %54 = arith.addf %52, %53 : vector<2x256xf32>
    %c0_13 = arith.constant 0 : index
    %c0_14 = arith.constant 0 : index
    %55 = vector.load %arg5[%c0_13, %c0_14] : memref<2x256xf32, #tpu.memory_space<vmem>>, vector<2x256xf32>
    %56 = arith.mulf %54, %55 : vector<2x256xf32>
    %57 = vector.broadcast %7 : vector<2x1xf32> to vector<2x256xf32>
    %58 = arith.addf %57, %56 : vector<2x256xf32>
    %c0_15 = arith.constant 0 : index
    %c0_16 = arith.constant 0 : index
    %c0_17 = arith.constant 0 : index
    %59 = vector.load %arg4[%c0_15, %c0_16, %c0_17] : memref<2x4x256xf32, #tpu.memory_space<vmem>>, vector<2x4x256xf32>
    %60 = vector.shape_cast %58 : vector<2x256xf32> to vector<2x1x256xf32>
    %61 = vector.broadcast %60 : vector<2x1x256xf32> to vector<2x4x256xf32>
    %62 = arith.addf %59, %61 : vector<2x4x256xf32>
    %cst_18 = arith.constant 0.000000e+00 : f32
    %63 = vector.broadcast %cst_18 : f32 to vector<2x4x256xf32>
    %64 = arith.maximumf %62, %63 : vector<2x4x256xf32>
    %c0_19 = arith.constant 0 : index
    %c0_20 = arith.constant 0 : index
    %c0_21 = arith.constant 0 : index
    %65 = vector.load %arg6[%c0_19, %c0_20, %c0_21] : memref<2x4x256xf32, #tpu.memory_space<vmem>>, vector<2x4x256xf32>
    tpu.vector_store %arg6[%c0_19, %c0_20, %c0_21], %64 {strides = array<i32>} : memref<2x4x256xf32, #tpu.memory_space<vmem>>, vector<2x4x256xf32>,
    return
  }
  func.func @transform_0(%arg0: i32) -> (i32, i32) {
    %c0_i32 = arith.constant 0 : i32
    %c0_i32_0 = arith.constant 0 : i32
    return %arg0, %c0_i32 : i32, i32
  }
  func.func @transform_1(%arg0: i32) -> (i32, i32) {
    %c0_i32 = arith.constant 0 : i32
    %c0_i32_0 = arith.constant 0 : i32
    %c0_i32_1 = arith.constant 0 : i32
    return %c0_i32, %c0_i32_0 : i32, i32
  }
  func.func @transform_2(%arg0: i32) -> (i32, i32) {
    %c0_i32 = arith.constant 0 : i32
    %c0_i32_0 = arith.constant 0 : i32
    %c0_i32_1 = arith.constant 0 : i32
    return %c0_i32, %c0_i32_0 : i32, i32
  }
  func.func @transform_3(%arg0: i32) -> (i32, i32, i32) {
    %c0_i32 = arith.constant 0 : i32
    %c0_i32_0 = arith.constant 0 : i32
    %c0_i32_1 = arith.constant 0 : i32
    return %arg0, %c0_i32, %c0_i32_0 : i32, i32, i32
  }
  func.func @transform_4(%arg0: i32) -> (i32, i32) {
    %c0_i32 = arith.constant 0 : i32
    %c0_i32_0 = arith.constant 0 : i32
    return %arg0, %c0_i32 : i32, i32
  }
  func.func @transform_5(%arg0: i32) -> (i32, i32, i32) {
    %c0_i32 = arith.constant 0 : i32
    %c0_i32_0 = arith.constant 0 : i32
    %c0_i32_1 = arith.constant 0 : i32
    return %arg0, %c0_i32, %c0_i32_0 : i32, i32, i32
  }
}

</mosaic_0001>

<bundles_post_ra>
// kernel: tpu_custom_call.1
= control target key start
LH: loop header
LB: loop body
LE: loop exit
PB: predicated region body
PF: predicated region fallthrough
CT: control target
= control target key end

     0   :  { %10 = vsyncpa [#allocation3], 0  ;;  %s522_s0 = inlined_call_operand.hbm [shape: f32[2,8], index: 0, kind: input, shape index: {}]   ;;  %s523_s1 = inlined_call_operand.hbm [shape: f32[1,256], index: 1, kind: input, shape index: {}]   ;;  %s524_s2 = inlined_call_operand.hbm [shape: f32[1,256], index: 2, kind: input, shape index: {}]   ;;  %s525_s3 = inlined_call_operand.hbm [shape: f32[2,4,256], index: 3, kind: input, shape index: {}]   ;;  %s526_s4 = inlined_call_operand.hbm [shape: f32[2,256], index: 4, kind: input, shape index: {}]   ;;  %s527_s5 = inlined_call_operand.hbm [shape: f32[2,4,256], index: 5, kind: output, shape index: {}]  }
   0x1   :  { %11 = vsyncpa [#allocation6], 0 }
   0x2   :  { %12 = vsyncpa [#allocation9], 0  ;;  %s30_s20 = sshll.u32 %s523_s1, 4  ;;  %s31_s20 = int_to_ptr.hbm [resolvable:$true] %s30_s20 }
   0x3   :  { %13 = vsyncpa [#allocation4], 0  ;;  %s444_s21 = smov [#allocation5]   ;;  %s51_s25 = sshll.u32 %s525_s3, 4  ;;  %s52_s25 = int_to_ptr.hbm [resolvable:$true] %s51_s25 }
   0x4   :  { %s32_s22 = sshll.u32 %s444_s21, 4  ;;  %s445_s26 = smov [#allocation8]   ;;  %s33_s22 = int_to_ptr.vmem [resolvable:$true] %s32_s22 }
   0x5   :  { %35 = dma.hbm_to_vmem [thread:$0]  %s31_s20, 32, %s33_s22, [#allocation6]  }
   0x6   :  { %s53_s27 = sshll.u32 %s445_s26, 4  ;;  %s446_s28 = smov 128   ;;  %s54_s27 = int_to_ptr.vmem [resolvable:$true] %s53_s27 }
   0x7   :  { %s447_s29 = smov 8   ;;  %s19_s6 = sshll.u32 %s522_s0, 4  ;;  %s20_s6 = int_to_ptr.hbm [resolvable:$true] %s19_s6 }
   0x8   :  { %59 = dma.hbm_to_vmem [thread:$0]  %s52_s25, 256, %s54_s27, [#allocation9], %s446_s28, %s446_s28, %s447_s29  }
   0x9   :  { %s448_s7 = smov [#allocation2]   ;;  %s41_s10 = sshll.u32 %s524_s2, 4  ;;  %s42_s10 = int_to_ptr.hbm [resolvable:$true] %s41_s10 }
   0xa   :  { %s21_s8 = sshll.u32 %s448_s7, 4  ;;  %s449_s11 = smov [#allocation7]   ;;  %s22_s8 = int_to_ptr.vmem [resolvable:$true] %s21_s8 }
   0xb   :  { %24 = dma.hbm_to_vmem [thread:$0]  %s20_s6, 32, %s22_s8, [#allocation3]  }
   0xc   :  { %s43_s12 = sshll.u32 %s449_s11, 4  ;;  %s65_s15 = sshll.u32 %s526_s4, 4  ;;  %s44_s12 = int_to_ptr.vmem [resolvable:$true] %s43_s12  ;;  %s66_s15 = int_to_ptr.hbm [resolvable:$true] %s65_s15 }
   0xd   :  { %46 = dma.hbm_to_vmem [thread:$0]  %s42_s10, 32, %s44_s12, [#allocation6]  }
   0xe   :  { %s450_s0 = smov [#allocation10]  }
   0xf   :  { %s67_s16 = sshll.u32 %s450_s0, 4  ;;  %s68_s16 = int_to_ptr.vmem [resolvable:$true] %s67_s16 }
  0x10   :  { %70 = dma.hbm_to_vmem [thread:$0]  %s66_s15, 64, %s68_s16, [#allocation9]  }
  0x11   :  { %436 = dma.done.wait [#allocation3], 32  }
  0x12   :  { %437 = vsyncadd [#allocation3], 4294967264 }
  0x13   :  { %438 = dma.done.wait [#allocation6], 64  }
  0x14   :  { %439 = vsyncadd [#allocation6], 4294967232 }
  0x15   :  { %440 = dma.done.wait [#allocation9], 320  }
  0x16   :  { %441 = vsyncadd [#allocation9], 4294966976  ;;  %v451_v0 = vmov 2   ;;  %v452_v1 = vmov 0   ;;  %v453_v2 = vmov 4   ;;  %v454_v5 = vmov 3  }
  0x17   :  { %281 = vset.pattern.permute.xlu1 %v451_v0  ;;  %279 = vset.pattern.permute.xlu0 %v452_v1  ;;  %v507_v3 = vld [vmem:[#allocation2] sm:$0x3]  ;;  %v455_v6 = vmov 1   ;;  %v93_v7 = vld [vmem:[#allocation7] sm:$0x3]  ;;  %vm155_vm0 = vcmask 1041408  }
  0x18   :  { %283 = vset.pattern.permute.xlu2 %v453_v2  ;;  %118 = vperm.xlu1 %281, %v507_v3   ;;  %v125_v4 = vmul.f32 2.0, %v507_v3  ;;  %v95_v8 = vperm.slane %v93_v7, 0  ;;  %v96_v9 = vperm.slane %v93_v7, 1  ;;  %v92_v14 = vld [vmem:[#allocation5] sm:$0x3]  ;;  %v456_v56 = vmov 5  }
  0x19   :  { %101 = vperm.xlu0 %279, %v507_v3   ;;  %138 = vperm.xlu2 %283, %v507_v3   ;;  %v107_v15 = vperm.slane %v92_v14, 0  ;;  %v108_v16 = vperm.slane %v92_v14, 1  ;;  %vm221_vm7 = vcmask 1040384   ;;  %vm223_vm8 = vcmask 1041409   ;;  %s458_s2 = smov [#allocation11]   ;;  %s249_s19 = sshll.u32 %s527_s5, 4  ;;  %s250_s19 = int_to_ptr.hbm [resolvable:$true] %s249_s19 }
  0x1a   :  { %vm232_vm9 = vcmask 1043456   ;;  %s247_s4 = sshll.u32 %s458_s2, 4  ;;  %s248_s4 = int_to_ptr.vmem [resolvable:$true] %s247_s4 }
  0x20   :  { %282 = vset.pattern.permute.xlu1 %v454_v5 }
  0x21   :  { %280 = vset.pattern.permute.xlu0 %v455_v6  ;;  %128 = vperm.xlu1 %282, %v125_v4  }
  0x22   :  { %112 = vperm.xlu0 %280, %v507_v3  }
  0x2a   :  { %284 = vset.pattern.permute.xlu0 %v456_v56 }
  0x73   :  { %v139_v19 = vpop.permute.xlu2 %138 }
  0x8a   :  { %v119_v10 = vpop.permute.xlu1 %118 }
  0x8b   :  { %v102_v11 = vpop.permute.xlu0 %101 }
  0x8c   :  { %v104_v12 = vsub.f32 %v95_v8, %v102_v11  ;;  %v105_v13 = vsub.f32 %v96_v9, %v102_v11  ;;  %v457_v8 = vmov 6   ;;  %v201_v9 = vld [vmem:[#allocation10] sm:$0xf] }
  0x8d   :  { %203 = vst [vmem:[#allocation1] ss:$4 sm:$0xff] %v201_v9 }
  0x8e   :  { %v121_v17 = vmul.f32 %v119_v10, %v104_v12  ;;  %v122_v18 = vmul.f32 %v119_v10, %v105_v13 }
  0x90   :  { %v123_v26 = vmul.f32 %v121_v17, %v104_v12  ;;  %v124_v27 = vmul.f32 %v122_v18, %v105_v13 }
  0x93   :  { %v129_v21 = vpop.permute.xlu1 %128 }
  0x94   :  { %v113_v20 = vpop.permute.xlu0 %112  ;;  %v131_v24 = vmul.f32 %v129_v21, %v104_v12  ;;  %v132_v25 = vmul.f32 %v129_v21, %v105_v13  ;;  %v205_v17 = vld.sshfl [vmem:[#allocation1 + $0x8] sm:$0xff pattern:$0x73625140] }
  0x95   :  { %v115_v22 = vsub.f32 %v107_v15, %v113_v20  ;;  %v116_v23 = vsub.f32 %v108_v16, %v113_v20  ;;  %v204_v20 = vld.sshfl [vmem:[#allocation1] sm:$0xff pattern:$0x73625140] }
  0x97   :  { %v133_v28 = vmul.f32 %v131_v24, %v115_v22  ;;  %v134_v29 = vmul.f32 %v132_v25, %v116_v23  ;;  %v141_v30 = vmul.f32 %v139_v19, %v115_v22  ;;  %v142_v31 = vmul.f32 %v139_v19, %v116_v23 }
  0x99   :  { %v135_v32 = vadd.f32 %v133_v28, %v123_v26  ;;  %v136_v33 = vadd.f32 %v134_v29, %v124_v27  ;;  %v143_v34 = vmul.f32 %v141_v30, %v115_v22  ;;  %v144_v35 = vmul.f32 %v142_v31, %v116_v23 }
  0x9b   :  { %v145_v36 = vadd.f32 %v143_v34, %v135_v32  ;;  %v146_v37 = vadd.f32 %v144_v35, %v136_v33  ;;  %v216_v33 = vld [vmem:[#allocation8] sm:$0xff] }
  0x9d   :  { %v147_v38 = vmul.f32 %v145_v36, %v145_v36  ;;  %v148_v39 = vmul.f32 %v146_v37, %v146_v37  ;;  %v217_v36 = vld [vmem:[#allocation8 + $0x8] sm:$0xff] }
  0x9f   :  { %v149_v40 = vsub.f32 0.0, %v147_v38  ;;  %v150_v41 = vsub.f32 0.0, %v148_v39 }
  0xa1   :  { %v151_v42 = vmul.f32 1.442695, %v149_v40  ;;  %v153_v43 = vmul.f32 1.442695, %v150_v41 }
  0xa3   :  { %286 = vpow2.f32 %v151_v42 }
  0xa4   :  { %288 = vpow2.f32 %v153_v43 }
  0xa9   :  { %v287_v44 = vpop.eup %286 }
  0xaa   :  { %v289_v45 = vpop.eup %288  ;;  %v156_v46 = vsel %vm155_vm0, %v287_v44, -inf }
  0xab   :  { %v157_v47 = vsel %vm155_vm0, %v289_v45, -inf }
  0xac   :  { %v158_v48 = vmax.f32 %v156_v46, %v157_v47 }
  0xae   :  { %159 = vmax.xlane.f32.xlu2 %v158_v48 }
 0x121   :  { %v160_v49 = vpop.xlane.xlu2 %159 }
 0x122   :  { %v161_v50 = vmul.f32 1e-06, %v160_v49 }
 0x124   :  { %vm162_vm1 = vcmp.lt.f32.partialorder %v287_v44, %v161_v50  ;;  %vm163_vm2 = vcmp.lt.f32.partialorder %v289_v45, %v161_v50 }
 0x125   :  { %v164_v51 = vsel %vm162_vm1, 0.0, %v287_v44  ;;  %v165_v52 = vsel %vm163_vm2, 0.0, %v289_v45 }
 0x126   :  { %v166_v53 = vsel %vm155_vm0, %v164_v51, inf  ;;  %v167_v54 = vsel %vm155_vm0, %v165_v52, inf }
 0x127   :  { %v168_v55 = vmin.f32 %v166_v53, %v167_v54 }
 0x129   :  { %169 = vmin.xlane.f32.xlu1 %v168_v55 }
 0x19c   :  { %v170_v57 = vpop.xlane.xlu1 %169 }
 0x19d   :  { %v171_v58 = vsub.f32 %v160_v49, %v170_v57  ;;  %v188_v10 = vsub.f32 %v164_v51, %v170_v57  ;;  %v189_v11 = vsub.f32 %v165_v52, %v170_v57 }
 0x19f   :  { %v172_v59 = vmax.f32 %v171_v58, 1e-30 }
 0x1a1   :  { %290 = vrcp.f32 %v172_v59  ;;  %v184_v63 = vand.u32 2147483648, %v172_v59  ;;  %v182_v1 = vand.u32 2147483647, %v172_v59  ;;  %vm178_vm4 = vweird.f32 %v172_v59 }
 0x1a3   :  { %v185_v4 = vor.u32 1.1754944e-38, %v184_v63  ;;  %vm183_vm6 = vcmp.eq.f32.partialorder %v182_v1, 8.507059e+37 }
 0x1a7   :  { %v291_v60 = vpop.eup %290 }
 0x1a8   :  { %v174_v61 = vmul.f32 %v291_v60, %v172_v59  ;;  %vm179_vm3 = vweird.f32 %v291_v60 }
 0x1a9   :  { %vm180_vm5 = vmor %vm178_vm4, %vm179_vm3 }
 0x1aa   :  { %v175_v62 = vsub.f32 1.0, %v174_v61 }
 0x1ac   :  { %v176_v0 = vmul.f32 %v291_v60, %v175_v62 }
 0x1ae   :  { %v177_v2 = vadd.f32 %v291_v60, %v176_v0 }
 0x1b0   :  { %v181_v5 = vsel %vm180_vm5, %v291_v60, %v177_v2 }
 0x1b1   :  { %v186_v6 = vsel %vm183_vm6, %v185_v4, %v181_v5 }
 0x1b2   :  { %v187_v7 = vmul.f32 %v186_v6, %v507_v3 }
 0x1b4   :  { %192 = vperm.xlu0 %284, %v187_v7  }
 0x1bc   :  { %285 = vset.pattern.permute.xlu0 %v457_v8 }
 0x1bd   :  { %211 = vperm.xlu0 %285, %v507_v3  }
 0x226   :  { %v193_v12 = vpop.permute.xlu0 %192 }
 0x227   :  { %v195_v13 = vmul.f32 %v193_v12, %v188_v10  ;;  %v196_v14 = vmul.f32 %v193_v12, %v189_v11 }
 0x229   :  { %v197_v15 = vmul.f32 4.0, %v195_v13  ;;  %v198_v16 = vmul.f32 4.0, %v196_v14 }
 0x22b   :  { %v199_v18 = vadd.f32 1.0, %v197_v15  ;;  %v200_v19 = vadd.f32 1.0, %v198_v16 }
 0x22d   :  { %v209_v21 = vmul.f32 %v205_v17, %v200_v19  ;;  %v208_v22 = vmul.f32 %v204_v20, %v199_v18 }
 0x22f   :  { %v212_v23 = vpop.permute.xlu0 %211 }
 0x230   :  { %v215_v24 = vadd.f32 %v212_v23, %v209_v21  ;;  %v214_v3 = vadd.f32 %v212_v23, %v208_v22 }
 0x232   :  { %v220_v25 = vrot.slane %v215_v24, 7 }
 0x234   :  { %v222_v26 = vsel %vm221_vm7, %v214_v3, %v220_v25  ;;  %v224_v27 = vsel %vm223_vm8, %v214_v3, %v220_v25 }
 0x235   :  { %v225_v28 = vrot.slane %v224_v27, 1  ;;  %v227_v29 = vperm.slane %v222_v26, 1  ;;  %v226_v30 = vperm.slane %v222_v26, 0 }
 0x237   :  { %v229_v31 = vperm.slane %v225_v28, 1  ;;  %v230_v32 = vrot.slane %v227_v29, 4  ;;  %v228_v34 = vperm.slane %v225_v28, 0 }
 0x239   :  { %v231_v35 = vrot.slane %v229_v31, 4  ;;  %v233_v37 = vsel %vm232_vm9, %v226_v30, %v230_v32 }
 0x23a   :  { %v237_v38 = vadd.f32 %v233_v37, %v216_v33 }
 0x23b   :  { %v234_v39 = vsel %vm232_vm9, %v228_v34, %v231_v35 }
 0x23c   :  { %v238_v40 = vadd.f32 %v234_v39, %v217_v36  ;;  %v239_v41 = vmax.f32 %v237_v38, 0.0 }
 0x23e   :  { %v240_v42 = vmax.f32 %v238_v40, 0.0  ;;  %241 = vst [vmem:[#allocation11] sm:$0xff] %v239_v41 }
 0x240   :  { %242 = vst [vmem:[#allocation11 + $0x8] sm:$0xff] %v240_v42 }
 0x241   :  { %255 = dma.vmem_to_hbm [thread:$0]  %s248_s4, 256, %s250_s19, [#allocation4], %s446_s28, %s446_s28, %s447_s29  }
 0x242   :  { %442 = dma.done.wait [#allocation4], 256  }
 0x243   :  { %443 = vsyncadd [#allocation4], 4294967040 }
 0x244   :  { %260 = vsyncpa [#allocation3], 1 }
 0x245   :  { %261 = vsyncpa [#allocation6], 1 }
 0x246   :  { %262 = vsyncpa [#allocation9], 1 }
 0x247   :  { %263 = vsyncpa [#allocation4], 1 }

</bundles_post_ra>
